<compile_context>
chip_gen: v7x
topology: tpu7x:2x2x1
jax: 0.10.0
libtpu: 0.0.40
codegen_flags: <defaults>
</compile_context>

<pallas_src>
import functools

import jax
import jax.numpy as jnp
from jax.experimental import pallas as pl
from jax.experimental.pallas import tpu as pltpu

_SUB = 8                 # sublanes per f32 vreg row-block
_LANE = 128              # lanes
_MAX_BLOCK_ROWS = 4096   # (4096,128) f32 tile = 2 MiB; x2 inputs x2 buffers = 8 MiB


def _round_up(x, mult):
    return ((x + mult - 1) // mult) * mult


def _sigmoid1eup(x):
    # Exactly sigmoid(x); 1 EUP push (tanh) + 2 VALU ops instead of exp+recip.
    return 0.5 * jnp.tanh(0.5 * x) + 0.5


def _dice_kernel(pred_ref, true_ref, acc_ref, *, block_rows, valid_rows_last,
                 needs_mask):
    """1-D grid over row-blocks of the (m, 128) lane-aligned slab.

    acc_ref is a resident (3, 8, 128) f32 block holding per-lane partial sums
    of [y_true*sigmoid(y_pred), y_true, sigmoid(y_pred)]; the tiny cross-lane
    fold + dice formula run once in the JAX epilogue.
    """
    i = pl.program_id(0)

    @pl.when(i == 0)
    def _():
        acc_ref[...] = jnp.zeros_like(acc_ref)

    # Elementwise hot path: EUP tanh + VPU multiplies/adds.
    p = _sigmoid1eup(pred_ref[...].astype(jnp.float32))
    t = true_ref[...].astype(jnp.float32)

    def accumulate(p, t):
        # Fold the block into vreg-shaped (8,128) partials with pure VPU adds;
        # the (block_rows,128)->(block_rows/8,8,128) reshape is tile-aligned
        # (each (8,128) group is exactly one f32 vreg) and lowers to a no-op.
        pr = p.reshape(block_rows // _SUB, _SUB, _LANE)
        tr = t.reshape(block_rows // _SUB, _SUB, _LANE)
        acc_ref[0] = acc_ref[0] + jnp.sum(tr * pr, axis=0)   # intersection
        acc_ref[1] = acc_ref[1] + jnp.sum(tr, axis=0)        # sum(y_true)
        acc_ref[2] = acc_ref[2] + jnp.sum(pr, axis=0)        # sum(sigmoid)

    if needs_mask:
        # Only the last block carries garbage rows (partial block read); all
        # other blocks take the unmasked fast path. Row-only mask, no column
        # iota / flat-index math.
        last = pl.num_programs(0) - 1

        @pl.when(i != last)
        def _():
            accumulate(p, t)

        @pl.when(i == last)
        def _():
            rows = jax.lax.broadcasted_iota(jnp.int32, (block_rows, _LANE), 0)
            valid = rows < valid_rows_last
            accumulate(jnp.where(valid, p, 0.0), jnp.where(valid, t, 0.0))
    else:
        accumulate(p, t)


def dice_loss(y_pred, y_true, smooth=1.0):
    """Pallas implementation of DiceLoss.forward(y_pred, y_true)."""
    assert y_pred.shape == y_true.shape
    total = int(y_pred.size)

    # Stream inputs in their native dtype; cast happens inside the kernel.
    pred_f = y_pred.reshape(-1)
    true_f = y_true.reshape(-1)

    lane_rem = total % _LANE
    m = total // _LANE          # lane-aligned rows handled by the kernel

    intersection = jnp.float32(0.0)
    sum_true = jnp.float32(0.0)
    sum_pred = jnp.float32(0.0)

    if m > 0:
        if lane_rem:
            # Prefix slice only in the misaligned case (never a full-array pad).
            pred_main = pred_f[: m * _LANE]
            true_main = true_f[: m * _LANE]
        else:
            pred_main, true_main = pred_f, true_f
        pred2d = pred_main.reshape(m, _LANE)
        true2d = true_main.reshape(m, _LANE)

        block_rows = min(_MAX_BLOCK_ROWS, _round_up(m, _SUB))
        nblocks = pl.cdiv(m, block_rows)
        valid_rows_last = m - (nblocks - 1) * block_rows
        needs_mask = valid_rows_last != block_rows

        in_spec = pl.BlockSpec((block_rows, _LANE), lambda i: (i, 0))

        partials = pl.pallas_call(
            functools.partial(
                _dice_kernel,
                block_rows=block_rows,
                valid_rows_last=valid_rows_last,
                needs_mask=needs_mask,
            ),
            out_shape=jax.ShapeDtypeStruct((3, _SUB, _LANE), jnp.float32),
            grid_spec=pltpu.PrefetchScalarGridSpec(
                num_scalar_prefetch=0,
                grid=(nblocks,),
                in_specs=[in_spec, in_spec],
                out_specs=pl.BlockSpec((3, _SUB, _LANE), lambda i: (0, 0, 0)),
            ),
            compiler_params=pltpu.CompilerParams(
                dimension_semantics=("arbitrary",),
            ),
        )(pred2d, true2d)

        # Tiny (3 KiB) epilogue: fold per-lane partials.
        sums = jnp.sum(partials, axis=(1, 2))
        intersection = sums[0]
        sum_true = sums[1]
        sum_pred = sums[2]

    if lane_rem:
        # <128 ragged-tail elements handled directly in JAX (no pad, no mask).
        tail_p = jax.nn.sigmoid(pred_f[m * _LANE:].astype(jnp.float32))
        tail_t = true_f[m * _LANE:].astype(jnp.float32)
        intersection = intersection + jnp.sum(tail_t * tail_p)
        sum_true = sum_true + jnp.sum(tail_t)
        sum_pred = sum_pred + jnp.sum(tail_p)

    dice = (2.0 * intersection + smooth) / (sum_true + sum_pred + smooth)
    return -dice


def _dice_loss_ref(y_pred, y_true, smooth=1.0):
    p = jax.nn.sigmoid(y_pred.reshape(-1).astype(jnp.float32))
    t = y_true.reshape(-1).astype(jnp.float32)
    inter = jnp.sum(t * p)
    return -((2.0 * inter + smooth) / (jnp.sum(t) + jnp.sum(p) + smooth))


if __name__ == "__main__":
    key = jax.random.PRNGKey(0)
    k1, k2 = jax.random.split(key)
    # NCHW logits and binary targets, small shapes.
    y_pred = jax.random.normal(k1, (2, 4, 16, 16), dtype=jnp.float32)
    y_true = (jax.random.uniform(k2, (2, 4, 16, 16)) > 0.5).astype(jnp.float32)

    loss = dice_loss(y_pred, y_true, smooth=1.0)
    loss = jax.block_until_ready(loss)

    ref = _dice_loss_ref(y_pred, y_true, smooth=1.0)
    assert jnp.allclose(loss, ref, atol=1e-5, rtol=1e-5), (loss, ref)
    print("KERNEL_OK")
</pallas_src>

<mosaic_0001>
module attributes {stable_mosaic.version = 11 : i64} {
  func.func @_dice_kernel(%arg0: i32, %arg1: memref<16x128xf32, #tpu.memory_space<vmem>>, %arg2: memref<16x128xf32, #tpu.memory_space<vmem>>, %arg3: memref<3x8x128xf32, #tpu.memory_space<vmem>>) attributes {dimension_semantics = [#tpu.dimension_semantics<arbitrary>], iteration_bounds = array<i64: 1>, scalar_prefetch = 0 : i64, scratch_operands = 0 : i64, tpu.core_type = #tpu.core_type<tc>, window_params = [{transform_indices = @transform_0, window_bounds = array<i64: 16, 128>}, {transform_indices = @transform_1, window_bounds = array<i64: 16, 128>}, {pipeline_mode = #tpu.pipeline_mode<synchronous>, transform_indices = @transform_2, window_bounds = array<i64: 3, 8, 128>}]} {
    %c0_i32 = arith.constant 0 : i32
    %0 = arith.cmpi eq, %arg0, %c0_i32 : i32
    %1 = arith.extui %0 : i1 to i32
    %c0_i32_0 = arith.constant 0 : i32
    %2 = arith.cmpi ne, %1, %c0_i32_0 : i32
    scf.if %2 {
      %cst_25 = arith.constant 0.000000e+00 : f32
      %36 = vector.broadcast %cst_25 : f32 to vector<3x8x128xf32>
      %c0_26 = arith.constant 0 : index
      %c0_27 = arith.constant 0 : index
      %c0_28 = arith.constant 0 : index
      %37 = vector.load %arg3[%c0_26, %c0_27, %c0_28] : memref<3x8x128xf32, #tpu.memory_space<vmem>>, vector<3x8x128xf32>
      tpu.vector_store %arg3[%c0_26, %c0_27, %c0_28], %36 {strides = array<i32>} : memref<3x8x128xf32, #tpu.memory_space<vmem>>, vector<3x8x128xf32>,
    } else {
    }
    %c0 = arith.constant 0 : index
    %c0_1 = arith.constant 0 : index
    %3 = vector.load %arg1[%c0, %c0_1] : memref<16x128xf32, #tpu.memory_space<vmem>>, vector<16x128xf32>
    %cst = arith.constant 5.000000e-01 : f32
    %4 = vector.broadcast %cst : f32 to vector<16x128xf32>
    %5 = arith.mulf %4, %3 : vector<16x128xf32>
    %6 = math.tanh %5 : vector<16x128xf32>
    %cst_2 = arith.constant 5.000000e-01 : f32
    %7 = vector.broadcast %cst_2 : f32 to vector<16x128xf32>
    %8 = arith.mulf %7, %6 : vector<16x128xf32>
    %cst_3 = arith.constant 5.000000e-01 : f32
    %9 = vector.broadcast %cst_3 : f32 to vector<16x128xf32>
    %10 = arith.addf %8, %9 : vector<16x128xf32>
    %c0_4 = arith.constant 0 : index
    %c0_5 = arith.constant 0 : index
    %11 = vector.load %arg2[%c0_4, %c0_5] : memref<16x128xf32, #tpu.memory_space<vmem>>, vector<16x128xf32>
    %12 = vector.shape_cast %10 : vector<16x128xf32> to vector<2x8x128xf32>
    %13 = vector.shape_cast %11 : vector<16x128xf32> to vector<2x8x128xf32>
    %c0_6 = arith.constant 0 : index
    %c0_7 = arith.constant 0 : index
    %c0_8 = arith.constant 0 : index
    %14 = vector.load %arg3[%c0_6, %c0_7, %c0_8] : memref<3x8x128xf32, #tpu.memory_space<vmem>>, vector<1x8x128xf32>
    %15 = vector.shape_cast %14 : vector<1x8x128xf32> to vector<8x128xf32>
    %16 = arith.mulf %13, %12 : vector<2x8x128xf32>
    %cst_9 = arith.constant dense<0.000000e+00> : vector<8x128xf32>
    %17 = vector.multi_reduction <add>, %16, %cst_9 [0] : vector<2x8x128xf32> to vector<8x128xf32>
    %18 = arith.addf %15, %17 : vector<8x128xf32>
    %c0_10 = arith.constant 0 : index
    %c0_11 = arith.constant 0 : index
    %c0_12 = arith.constant 0 : index
    %19 = vector.load %arg3[%c0_10, %c0_11, %c0_12] : memref<3x8x128xf32, #tpu.memory_space<vmem>>, vector<1x8x128xf32>
    %20 = vector.shape_cast %19 : vector<1x8x128xf32> to vector<8x128xf32>
    %21 = vector.shape_cast %18 : vector<8x128xf32> to vector<1x8x128xf32>
    tpu.vector_store %arg3[%c0_10, %c0_11, %c0_12], %21 {strides = array<i32>} : memref<3x8x128xf32, #tpu.memory_space<vmem>>, vector<1x8x128xf32>,
    %c1 = arith.constant 1 : index
    %c0_13 = arith.constant 0 : index
    %c0_14 = arith.constant 0 : index
    %22 = vector.load %arg3[%c1, %c0_13, %c0_14] : memref<3x8x128xf32, #tpu.memory_space<vmem>>, vector<1x8x128xf32>
    %23 = vector.shape_cast %22 : vector<1x8x128xf32> to vector<8x128xf32>
    %cst_15 = arith.constant dense<0.000000e+00> : vector<8x128xf32>
    %24 = vector.multi_reduction <add>, %13, %cst_15 [0] : vector<2x8x128xf32> to vector<8x128xf32>
    %25 = arith.addf %23, %24 : vector<8x128xf32>
    %c1_16 = arith.constant 1 : index
    %c0_17 = arith.constant 0 : index
    %c0_18 = arith.constant 0 : index
    %26 = vector.load %arg3[%c1_16, %c0_17, %c0_18] : memref<3x8x128xf32, #tpu.memory_space<vmem>>, vector<1x8x128xf32>
    %27 = vector.shape_cast %26 : vector<1x8x128xf32> to vector<8x128xf32>
    %28 = vector.shape_cast %25 : vector<8x128xf32> to vector<1x8x128xf32>
    tpu.vector_store %arg3[%c1_16, %c0_17, %c0_18], %28 {strides = array<i32>} : memref<3x8x128xf32, #tpu.memory_space<vmem>>, vector<1x8x128xf32>,
    %c2 = arith.constant 2 : index
    %c0_19 = arith.constant 0 : index
    %c0_20 = arith.constant 0 : index
    %29 = vector.load %arg3[%c2, %c0_19, %c0_20] : memref<3x8x128xf32, #tpu.memory_space<vmem>>, vector<1x8x128xf32>
    %30 = vector.shape_cast %29 : vector<1x8x128xf32> to vector<8x128xf32>
    %cst_21 = arith.constant dense<0.000000e+00> : vector<8x128xf32>
    %31 = vector.multi_reduction <add>, %12, %cst_21 [0] : vector<2x8x128xf32> to vector<8x128xf32>
    %32 = arith.addf %30, %31 : vector<8x128xf32>
    %c2_22 = arith.constant 2 : index
    %c0_23 = arith.constant 0 : index
    %c0_24 = arith.constant 0 : index
    %33 = vector.load %arg3[%c2_22, %c0_23, %c0_24] : memref<3x8x128xf32, #tpu.memory_space<vmem>>, vector<1x8x128xf32>
    %34 = vector.shape_cast %33 : vector<1x8x128xf32> to vector<8x128xf32>
    %35 = vector.shape_cast %32 : vector<8x128xf32> to vector<1x8x128xf32>
    tpu.vector_store %arg3[%c2_22, %c0_23, %c0_24], %35 {strides = array<i32>} : memref<3x8x128xf32, #tpu.memory_space<vmem>>, vector<1x8x128xf32>,
    return
  }
  func.func @transform_0(%arg0: i32) -> (i32, i32) {
    %c0_i32 = arith.constant 0 : i32
    %c0_i32_0 = arith.constant 0 : i32
    return %arg0, %c0_i32 : i32, i32
  }
  func.func @transform_1(%arg0: i32) -> (i32, i32) {
    %c0_i32 = arith.constant 0 : i32
    %c0_i32_0 = arith.constant 0 : i32
    return %arg0, %c0_i32 : i32, i32
  }
  func.func @transform_2(%arg0: i32) -> (i32, i32, i32) {
    %c0_i32 = arith.constant 0 : i32
    %c0_i32_0 = arith.constant 0 : i32
    %c0_i32_1 = arith.constant 0 : i32
    %c0_i32_2 = arith.constant 0 : i32
    return %c0_i32, %c0_i32_0, %c0_i32_1 : i32, i32, i32
  }
}

</mosaic_0001>

<bundles_post_ra>
// kernel: tpu_custom_call.1
= control target key start
LH: loop header
LB: loop body
LE: loop exit
PB: predicated region body
PF: predicated region fallthrough
CT: control target
= control target key end

     0   :  { %7 = vsyncpa [#allocation3], 0  ;;  %s240_s0 = inlined_call_operand.hbm [shape: f32[16,128], index: 0, kind: input, shape index: {}]   ;;  %s241_s1 = inlined_call_operand.hbm [shape: f32[16,128], index: 1, kind: input, shape index: {}]   ;;  %s242_s2 = inlined_call_operand.hbm [shape: f32[3,8,128], index: 2, kind: output, shape index: {}]  }
   0x1   :  { %8 = vsyncpa [#allocation6], 0 }
   0x2   :  { %9 = vsyncpa [#allocation4], 0  ;;  %s175_s9 = smov [#allocation2]   ;;  %s103_s13 = scalar_lea.hbm %s240_s0, 256 }
   0x3   :  { %s15_s10 = sshll.u32 %s175_s9, 4  ;;  %p104_p0 = scmp.ne.s32.totalorder %s240_s0, %s103_s13  ;;  %s16_s10 = int_to_ptr.vmem [resolvable:$true] %s15_s10 }
   0x4   :  { %p107_p1 = scmp.lt.u32.totalorder %s103_s13, %s240_s0 }
   0x6   :  { %p109_p2 = pnand %p107_p1, %p104_p0 }
   0x8   :  { %112 = shalt.err (!%p109_p2)
}
   0x9   :  { %s113_s18 = scalar_lea.vmem %s16_s10, 256  ;;  %p118_p4 = scmp.lt.s32.totalorder %s16_s10, %s16_s10 }
   0xa   :  { %p114_p3 = scmp.ne.s32.totalorder %s16_s10, %s113_s18  ;;  %p119_p5 = scmp.lt.s32.totalorder %s113_s18, %s113_s18 }
   0xc   :  { %p120_p6 = por %p119_p5, %p118_p4 }
   0xe   :  { %p121_p7 = pnand %p120_p6, %p114_p3 }
  0x10   :  { %124 = shalt.err (!%p121_p7)
}
  0x11   :  { %s176_s19 = smov 128   ;;  %s177_s20 = smov 8  }
  0x12   :  { %21 = dma.hbm_to_vmem [thread:$0]  %s240_s0, 256, %s16_s10, [#allocation3], %s176_s19, %s176_s19, %s177_s20  }
  0x13   :  { %s178_s23 = smov [#allocation5]   ;;  %s125_s27 = scalar_lea.hbm %s241_s1, 256 }
  0x14   :  { %s27_s24 = sshll.u32 %s178_s23, 4  ;;  %p126_p8 = scmp.ne.s32.totalorder %s241_s1, %s125_s27  ;;  %s28_s24 = int_to_ptr.vmem [resolvable:$true] %s27_s24 }
  0x15   :  { %p129_p9 = scmp.lt.u32.totalorder %s125_s27, %s241_s1 }
  0x17   :  { %p131_p10 = pnand %p129_p9, %p126_p8 }
  0x19   :  { %134 = shalt.err (!%p131_p10)
}
  0x1a   :  { %s135_s4 = scalar_lea.vmem %s28_s24, 256  ;;  %p140_p12 = scmp.lt.s32.totalorder %s28_s24, %s28_s24 }
  0x1b   :  { %p136_p11 = scmp.ne.s32.totalorder %s28_s24, %s135_s4  ;;  %p141_p13 = scmp.lt.s32.totalorder %s135_s4, %s135_s4 }
  0x1d   :  { %p142_p0 = por %p141_p13, %p140_p12 }
  0x1f   :  { %p143_p1 = pnand %p142_p0, %p136_p11 }
  0x21   :  { %146 = shalt.err (!%p143_p1)
}
  0x22   :  { %33 = dma.hbm_to_vmem [thread:$0]  %s241_s1, 256, %s28_s24, [#allocation6], %s176_s19, %s176_s19, %s177_s20  }
  0x23   :  { %169 = dma.done.wait [#allocation3], 256  }
  0x24   :  { %170 = vsyncadd [#allocation3], 4294967040 }
  0x25   :  { %171 = dma.done.wait [#allocation6], 256  }
  0x26   :  { %172 = vsyncadd [#allocation6], 4294967040  ;;  %v47_v0 = vld [vmem:[#allocation2] sm:$0xff]  ;;  %v48_v1 = vld [vmem:[#allocation2 + $0x8] sm:$0xff]  ;;  %s179_s1 = smov [#allocation7]  }
  0x27   :  { %v49_v2 = vmul.f32 0.5, %v47_v0  ;;  %v50_v3 = vmul.f32 0.5, %v48_v1  ;;  %v57_v4 = vld [vmem:[#allocation5] sm:$0xff]  ;;  %v58_v5 = vld [vmem:[#allocation5 + $0x8] sm:$0xff]  ;;  %s80_s6 = sshll.u32 %s179_s1, 4  ;;  %s81_s6 = int_to_ptr.vmem [resolvable:$true] %s80_s6 }
  0x28   :  { %v67_v6 = vadd.f32 %v58_v5, %v57_v4  ;;  %s147_s7 = scalar_lea.vmem %s81_s6, 384  ;;  %p152_p3 = scmp.lt.s32.totalorder %s81_s6, %s81_s6 }
  0x29   :  { %99 = vtanh.f32 %v49_v2  ;;  %p148_p2 = scmp.ne.s32.totalorder %s81_s6, %s147_s7  ;;  %p153_p4 = scmp.lt.s32.totalorder %s147_s7, %s147_s7 }
  0x2a   :  { %101 = vtanh.f32 %v50_v3  ;;  %69 = vst [vmem:[#allocation7 + $0x8] sm:$0xff] %v67_v6 }
  0x2b   :  { %p154_p5 = por %p153_p4, %p152_p3 }
  0x2d   :  { %p155_p6 = pnand %p154_p5, %p148_p2 }
  0x33   :  { %v100_v7 = vpop.eup %99 }
  0x34   :  { %v102_v8 = vpop.eup %101  ;;  %v53_v9 = vmul.f32 0.5, %v100_v7 }
  0x35   :  { %v54_v10 = vmul.f32 0.5, %v102_v8 }
  0x36   :  { %v55_v11 = vadd.f32 0.5, %v53_v9 }
  0x37   :  { %v56_v12 = vadd.f32 0.5, %v54_v10 }
  0x38   :  { %v60_v13 = vmul.f32 %v57_v4, %v55_v11 }
  0x39   :  { %v61_v14 = vmul.f32 %v58_v5, %v56_v12  ;;  %v72_v15 = vadd.f32 %v56_v12, %v55_v11 }
  0x3b   :  { %v62_v16 = vadd.f32 %v61_v14, %v60_v13  ;;  %74 = vst [vmem:[#allocation7 + $0x10] sm:$0xff] %v72_v15 }
  0x3d   :  { %64 = vst [vmem:[#allocation7] sm:$0xff] %v62_v16 }
  0x3e   :  { %158 = shalt.err (!%p155_p6)
}
  0x3f   :  { %s159_s10 = scalar_lea.hbm %s242_s2, 384 }
  0x40   :  { %p160_p7 = scmp.ne.s32.totalorder %s242_s2, %s159_s10  ;;  %p163_p8 = scmp.lt.u32.totalorder %s159_s10, %s242_s2 }
  0x42   :  { %p165_p9 = pnand %p163_p8, %p160_p7 }
  0x44   :  { %168 = shalt.err (!%p165_p9)
}
  0x45   :  { %86 = dma.vmem_to_hbm [thread:$0]  %s81_s6, 384, %s242_s2, [#allocation4], %s176_s19, %s176_s19, %s177_s20  }
  0x46   :  { %173 = dma.done.wait [#allocation4], 384  }
  0x47   :  { %174 = vsyncadd [#allocation4], 4294966912 }
  0x48   :  { %90 = vsyncpa [#allocation3], 1 }
  0x49   :  { %91 = vsyncpa [#allocation6], 1 }
  0x4a   :  { %92 = vsyncpa [#allocation4], 1 }

</bundles_post_ra>
